<compile_context>
chip_gen: v7x
topology: tpu7x:2x2x1
jax: 0.10.0
libtpu: 0.0.40
codegen_flags: <defaults>
</compile_context>

<pallas_src>
import functools

import jax
import jax.numpy as jnp
from jax.experimental import pallas as pl
from jax.experimental.pallas import tpu as pltpu


def _cdiv(a, b):
    return -(-a // b)


def _round_up(x, m):
    return _cdiv(x, m) * m


def _pad_and_tile(dim, align, cap):
    """Return (padded_dim, tile) with tile dividing padded_dim.

    If the dim fits under the cap, use one full-dim block (no padding needed, even if
    unaligned — full-extent blocks are always legal). Otherwise pad lightly to an
    `align`-aligned size that the tile divides evenly.
    """
    if dim <= cap:
        return dim, dim
    n = _cdiv(dim, cap)
    tile = _round_up(_cdiv(dim, n), align)
    return tile * n, tile


def projection_head_kernel(x_ref, w_ref, b_ref, o_ref):
    k = pl.program_id(2)

    @pl.when(k == 0)
    def _init():
        o_ref[...] = jnp.zeros_like(o_ref)

    # Hot path: MXU matmul with f32 accumulation directly into the resident output
    # block (no scratch accumulator, no epilogue tile copy).
    o_ref[...] += jnp.dot(x_ref[...], w_ref[...], preferred_element_type=jnp.float32)

    @pl.when(k == pl.num_programs(2) - 1)
    def _epilogue():
        # Bias add + ReLU ride on the VPU under MXU/DMA slack.
        o_ref[...] = jnp.maximum(o_ref[...] + b_ref[...], 0.0)


@functools.partial(jax.jit, static_argnames=("tm_cap", "tn_cap", "tk_cap"))
def projection_head(x, w, b, *, tm_cap=1024, tn_cap=512, tk_cap=1024):
    """x: (B, D_in), w: (D_in, D_out), b: (D_out,) -> ReLU(x @ w + b) in float32."""
    x = x.astype(jnp.float32)
    w = w.astype(jnp.float32)
    b = b.astype(jnp.float32)

    B, D_in = x.shape
    D_out = w.shape[1]

    # Tile selection (M sublane-aligned to 8; K/N lane-aligned to 128 when tiled).
    Mp, tm = _pad_and_tile(B, 8, tm_cap)
    Np, tn = _pad_and_tile(D_out, 128, tn_cap)
    Kp, tk = _pad_and_tile(D_in, 128, tk_cap)

    # v7x megacore: guarantee >=2 parallel blocks when the batch is big enough so the
    # "parallel" axes can be sharded across both TensorCores.
    if Mp // tm == 1 and Np // tn == 1 and Mp >= 256:
        tm = _round_up(_cdiv(Mp, 2), 8)
        Mp = 2 * tm

    grid_m, grid_n, grid_k = Mp // tm, Np // tn, Kp // tk

    # Only materialize padded copies when padding is actually required
    # (common aligned case: zero jnp.pad HBM round-trips).
    if Mp != B or Kp != D_in:
        x = jnp.pad(x, ((0, Mp - B), (0, Kp - D_in)))
    if Kp != D_in or Np != D_out:
        w = jnp.pad(w, ((0, Kp - D_in), (0, Np - D_out)))
    b2 = b.reshape(1, D_out)
    if Np != D_out:
        b2 = jnp.pad(b2, ((0, 0), (0, Np - D_out)))

    # VMEM budget: double-buffered x/w/bias inputs plus the (double-buffered) resident
    # output block; 2x headroom, capped at 48 MiB (safe even on v7x's 64 MiB physical).
    itemsize = 4
    vmem_need = (2 * (tm * tk + tk * tn + tn) + 2 * tm * tn) * itemsize
    vmem_limit = int(min(max(2 * vmem_need, 32 << 20), 48 << 20))

    out = pl.pallas_call(
        projection_head_kernel,
        out_shape=jax.ShapeDtypeStruct((Mp, Np), jnp.float32),
        grid=(grid_m, grid_n, grid_k),
        in_specs=[
            pl.BlockSpec((tm, tk), lambda i, j, k: (i, k)),
            pl.BlockSpec((tk, tn), lambda i, j, k: (k, j)),
            pl.BlockSpec((1, tn), lambda i, j, k: (0, j)),
        ],
        out_specs=pl.BlockSpec((tm, tn), lambda i, j, k: (i, j)),
        compiler_params=pltpu.CompilerParams(
            dimension_semantics=("parallel", "parallel", "arbitrary"),
            vmem_limit_bytes=vmem_limit,
        ),
        cost_estimate=pl.CostEstimate(
            flops=2 * Mp * Kp * Np,
            transcendentals=0,
            # x is re-read once per N block, w/bias once per M block, out written once.
            bytes_accessed=(Mp * Kp * grid_n + Kp * Np * grid_m
                            + Np * grid_m + Mp * Np) * itemsize,
        ),
    )(x, w, b2)

    if Mp != B or Np != D_out:
        out = out[:B, :D_out]
    return out


def reference(x, w, b):
    return jnp.maximum(x @ w + b[None, :], 0.0)


if __name__ == "__main__":
    key = jax.random.PRNGKey(0)
    k_x, k_w, k_b = jax.random.split(key, 3)

    batch, input_dim, output_dim = 8, 32, 16

    x = jax.random.normal(k_x, (batch, input_dim), dtype=jnp.float32)
    # Deterministic nn.Linear-style init (weight stored pre-transposed: (D_in, D_out)).
    bound = 1.0 / (input_dim ** 0.5)
    w = jax.random.uniform(k_w, (input_dim, output_dim), jnp.float32, -bound, bound)
    b = jax.random.uniform(k_b, (output_dim,), jnp.float32, -bound, bound)

    out = projection_head(x, w, b)
    jax.block_until_ready(out)

    ref = reference(x, w, b)
    assert out.shape == (batch, output_dim)
    assert jnp.allclose(out, ref, atol=1e-5, rtol=1e-5)

    print("KERNEL_OK")
</pallas_src>

<mosaic_0001>
module attributes {stable_mosaic.version = 11 : i64} {
  func.func @projection_head_kernel(%arg0: i32, %arg1: i32, %arg2: i32, %arg3: memref<8x32xf32, #tpu.memory_space<vmem>>, %arg4: memref<32x16xf32, #tpu.memory_space<vmem>>, %arg5: memref<1x16xf32, #tpu.memory_space<vmem>>, %arg6: memref<8x16xf32, #tpu.memory_space<vmem>>) attributes {dimension_semantics = [#tpu.dimension_semantics<parallel>, #tpu.dimension_semantics<parallel>, #tpu.dimension_semantics<arbitrary>], iteration_bounds = array<i64: 1, 1, 1>, scalar_prefetch = 0 : i64, scratch_operands = 0 : i64, tpu.core_type = #tpu.core_type<tc>, window_params = [{transform_indices = @transform_0, window_bounds = array<i64: 8, 32>}, {transform_indices = @transform_1, window_bounds = array<i64: 32, 16>}, {transform_indices = @transform_2, window_bounds = array<i64: 1, 16>}, {transform_indices = @transform_3, window_bounds = array<i64: 8, 16>}]} {
    %c0_i32 = arith.constant 0 : i32
    %0 = arith.cmpi eq, %arg2, %c0_i32 : i32
    %1 = arith.extui %0 : i1 to i32
    %c0_i32_0 = arith.constant 0 : i32
    %2 = arith.cmpi ne, %1, %c0_i32_0 : i32
    scf.if %2 {
      %cst_10 = arith.constant 0.000000e+00 : f32
      %12 = vector.broadcast %cst_10 : f32 to vector<8x16xf32>
      %c0_11 = arith.constant 0 : index
      %c0_12 = arith.constant 0 : index
      %13 = vector.load %arg6[%c0_11, %c0_12] : memref<8x16xf32, #tpu.memory_space<vmem>>, vector<8x16xf32>
      tpu.vector_store %arg6[%c0_11, %c0_12], %12 {strides = array<i32>} : memref<8x16xf32, #tpu.memory_space<vmem>>, vector<8x16xf32>,
    } else {
    }
    %c0 = arith.constant 0 : index
    %c0_1 = arith.constant 0 : index
    %3 = vector.load %arg6[%c0, %c0_1] : memref<8x16xf32, #tpu.memory_space<vmem>>, vector<8x16xf32>
    %c0_2 = arith.constant 0 : index
    %c0_3 = arith.constant 0 : index
    %4 = vector.load %arg3[%c0_2, %c0_3] : memref<8x32xf32, #tpu.memory_space<vmem>>, vector<8x32xf32>
    %c0_4 = arith.constant 0 : index
    %c0_5 = arith.constant 0 : index
    %5 = vector.load %arg4[%c0_4, %c0_5] : memref<32x16xf32, #tpu.memory_space<vmem>>, vector<32x16xf32>
    %cst = arith.constant dense<0.000000e+00> : vector<8x16xf32>
    %6 = tpu.matmul %4, %5, %cst {dimension_numbers = #tpu.dot_dimension_numbers<[1], [0], [0], [1], [0, 0, 1, 1], [], []>} : vector<8x32xf32>, vector<32x16xf32>, vector<8x16xf32> -> vector<8x16xf32>
    %7 = arith.addf %3, %6 : vector<8x16xf32>
    %c0_6 = arith.constant 0 : index
    %c0_7 = arith.constant 0 : index
    %8 = vector.load %arg6[%c0_6, %c0_7] : memref<8x16xf32, #tpu.memory_space<vmem>>, vector<8x16xf32>
    tpu.vector_store %arg6[%c0_6, %c0_7], %7 {strides = array<i32>} : memref<8x16xf32, #tpu.memory_space<vmem>>, vector<8x16xf32>,
    %c0_i32_8 = arith.constant 0 : i32
    %9 = arith.cmpi eq, %arg2, %c0_i32_8 : i32
    %10 = arith.extui %9 : i1 to i32
    %c0_i32_9 = arith.constant 0 : i32
    %11 = arith.cmpi ne, %10, %c0_i32_9 : i32
    scf.if %11 {
      %c0_10 = arith.constant 0 : index
      %c0_11 = arith.constant 0 : index
      %12 = vector.load %arg6[%c0_10, %c0_11] : memref<8x16xf32, #tpu.memory_space<vmem>>, vector<8x16xf32>
      %c0_12 = arith.constant 0 : index
      %c0_13 = arith.constant 0 : index
      %13 = vector.load %arg5[%c0_12, %c0_13] : memref<1x16xf32, #tpu.memory_space<vmem>>, vector<1x16xf32>
      %14 = vector.broadcast %13 : vector<1x16xf32> to vector<8x16xf32>
      %15 = arith.addf %12, %14 : vector<8x16xf32>
      %cst_14 = arith.constant 0.000000e+00 : f32
      %16 = vector.broadcast %cst_14 : f32 to vector<8x16xf32>
      %17 = arith.maximumf %15, %16 : vector<8x16xf32>
      %c0_15 = arith.constant 0 : index
      %c0_16 = arith.constant 0 : index
      %18 = vector.load %arg6[%c0_15, %c0_16] : memref<8x16xf32, #tpu.memory_space<vmem>>, vector<8x16xf32>
      tpu.vector_store %arg6[%c0_15, %c0_16], %17 {strides = array<i32>} : memref<8x16xf32, #tpu.memory_space<vmem>>, vector<8x16xf32>,
    } else {
    }
    return
  }
  func.func @transform_0(%arg0: i32, %arg1: i32, %arg2: i32) -> (i32, i32) {
    %c0_i32 = arith.constant 0 : i32
    return %arg0, %arg2 : i32, i32
  }
  func.func @transform_1(%arg0: i32, %arg1: i32, %arg2: i32) -> (i32, i32) {
    %c0_i32 = arith.constant 0 : i32
    return %arg2, %arg1 : i32, i32
  }
  func.func @transform_2(%arg0: i32, %arg1: i32, %arg2: i32) -> (i32, i32) {
    %c0_i32 = arith.constant 0 : i32
    %c0_i32_0 = arith.constant 0 : i32
    return %c0_i32, %arg1 : i32, i32
  }
  func.func @transform_3(%arg0: i32, %arg1: i32, %arg2: i32) -> (i32, i32) {
    %c0_i32 = arith.constant 0 : i32
    return %arg0, %arg1 : i32, i32
  }
}

</mosaic_0001>

<bundles_post_ra>
// kernel: projection_head.1
= control target key start
LH: loop header
LB: loop body
LE: loop exit
PB: predicated region body
PF: predicated region fallthrough
CT: control target
= control target key end

     0   :  { %vm19_vm0 = vcmask 130048   ;;  %v184_v3 = vmov 0.0|0.0   ;;  %v185_v6 = vmov 0.0   ;;  %s241_s0 = inlined_call_operand.vmem [shape: f32[8,32], index: 0, kind: input, shape index: {}]   ;;  %s242_s1 = inlined_call_operand.vmem [shape: f32[32,16], index: 1, kind: input, shape index: {}]   ;;  %s243_s2 = inlined_call_operand.vmem [shape: f32[1,16], index: 2, kind: input, shape index: {}]   ;;  %s244_s3 = inlined_call_operand.hbm [shape: f32[8,16], index: 3, kind: output, shape index: {}]  }
   0x1   :  { %v23_v0 = vld [vmem:[%s242_s1] sm:$0xff]  ;;  %v24_v1 = vld [vmem:[%s242_s1 + $0x8] sm:$0xff]  ;;  %v25_v2 = vld [vmem:[%s242_s1 + $0x10] sm:$0xff]  ;;  %150 = vmatprep.subr.bf16.mxu0 %v184_v3  ;;  %20 = vst.msk [vmem:[#allocation2] sm:$0xff] %vm19_vm0, %v185_v6 }
   0x2   :  { %v151_v4 = vpack.c.bf16 %v24_v1, %v23_v0  ;;  %v26_v5 = vld [vmem:[%s242_s1 + $0x18] sm:$0xff] }
   0x3   :  { %8 = vsyncpa [#allocation3], 0  ;;  %vm186_vm1 = vmmov 0   ;;  %v154_v7 = vpack.c.bf16 %v26_v5, %v25_v2  ;;  %v22_v8 = vld [vmem:[%s241_s0] sm:$0xff]  ;;  %vm27_vm2 = vcmask 261120   ;;  %s187_s23 = smov [#allocation2]  }
   0x4   :  { %147 = vmatprep.mubr.msk.f32.mxu0 %vm186_vm1, %v185_v6  ;;  %152 = vmatpush3.bf16.msra.mxu0 %v151_v4  ;;  %v133_v13 = vld [vmem:[%s243_s2] ss:$0 sm:$0xff]  ;;  %s124_s24 = sshll.u32 %s187_s23, 4  ;;  %s125_s24 = int_to_ptr.vmem [resolvable:$true] %s124_s24 }
   0x5   :  { %153 = vmatprep.subr.bf16.mxu0 %v184_v3  ;;  %s160_s0 = scalar_lea.vmem %s125_s24, 128  ;;  %p165_p1 = scmp.lt.s32.totalorder %s125_s24, %s125_s24 }
   0x6   :  { %p161_p0 = scmp.ne.s32.totalorder %s125_s24, %s160_s0  ;;  %p166_p2 = scmp.lt.s32.totalorder %s160_s0, %s160_s0 }
   0x8   :  { %155 = vmatpush3.bf16.msra.mxu0 %v154_v7  ;;  %v21_v9 = vld [vmem:[#allocation2] sm:$0xff]  ;;  %p167_p3 = por %p166_p2, %p165_p1 }
   0xa   :  { %p168_p4 = pnand %p167_p3, %p161_p0 }
   0xb   :  { %148 = vmatmul.mubr.msk.f32.vlgmr.msra.gmra.mrb[0].mxu0 %vm27_vm2, %v22_v8 }
  0xde   :  { %v97_v10 = vpop.f32.mrb[0].mxu0 }
  0xdf   :  { %v101_v11 = vadd.f32 %v97_v10, %v21_v9  ;;  %v149_v12 = vpop.f32.mrb[1].mxu0 }
  0xe1   :  { %103 = vst.msk [vmem:[#allocation2] sm:$0xff] %vm19_vm0, %v101_v11 }
  0xe8   :  { %v107_v14 = vld [vmem:[#allocation2] sm:$0xff] }
  0xe9   :  { %v115_v15 = vadd.f32 %v133_v13, %v107_v14 }
  0xeb   :  { %v116_v16 = vmax.f32 %v115_v15, 0.0 }
  0xed   :  { %117 = vst.msk [vmem:[#allocation2] sm:$0xff] %vm19_vm0, %v116_v16 }
  0xee   :  { %171 = shalt.err (!%p168_p4)
}
  0xef   :  { %s172_s27 = scalar_lea.hbm %s244_s3, 128 }
  0xf0   :  { %p173_p5 = scmp.ne.s32.totalorder %s244_s3, %s172_s27  ;;  %p176_p6 = scmp.lt.u32.totalorder %s172_s27, %s244_s3 }
  0xf2   :  { %p178_p7 = pnand %p176_p6, %p173_p5 }
  0xf4   :  { %181 = shalt.err (!%p178_p7)
}
  0xf5   :  { %127 = dma.vmem_to_hbm [thread:$0]  %s125_s24, 128, %s244_s3, [#allocation3]  }
  0xf6   :  { %182 = dma.done.wait [#allocation3], 128  }
  0xf7   :  { %183 = vsyncadd [#allocation3], 4294967168 }
  0xf8   :  { %131 = vsyncpa [#allocation3], 1 }

</bundles_post_ra>
